<compile_context>
chip_gen: v7x
topology: tpu7x:2x2x1
jax: 0.10.0
libtpu: 0.0.40
codegen_flags: <defaults>
</compile_context>

<pallas_src>
import functools

import jax
import jax.numpy as jnp
from jax.experimental import pallas as pl
from jax.experimental.pallas import tpu as pltpu

SIZE_IN = 28 * 28   # 784
SIZE_HID = 500
SIZE_OUT = 10

# Lane-aligned (multiple of 128) padded feature dims used inside the kernel.
HID_PAD = 512
OUT_PAD = 128


def mlp_kernel(x_ref, w1_ref, b1_ref, w2_ref, b2_ref, o_ref):
    # l1: x @ W1 (bf16 operands, f32 accumulation on the MXU) + b1, ReLU on the VPU.
    h = jnp.dot(x_ref[...], w1_ref[...], preferred_element_type=jnp.float32)
    h = jnp.maximum(h + b1_ref[...], 0.0)
    # l2: h @ W2 + b2.  h is cast back to bf16 so both matmuls take the fast
    # bf16 MXU path (matters most on v5e).  Output tile is lane-dense (128 wide)
    # so the final store is a single unmasked vst.
    o = jnp.dot(h.astype(jnp.bfloat16), w2_ref[...],
                preferred_element_type=jnp.float32)
    o_ref[...] = o + b2_ref[...]


@jax.jit
def nn_forward(x, w1, b1, w2, b2):
    """x: (B, 784) f32; w1: (784, 500); b1: (1, 500); w2: (500, 10); b2: (1, 10).
    Returns (B, 10) f32 logits, matching the PyTorch NN.forward semantics."""
    B = x.shape[0]

    # --- lane-align feature dims with zero padding + cast weights to bf16 ---
    w1p = jnp.pad(w1, ((0, 0), (0, HID_PAD - SIZE_HID))).astype(jnp.bfloat16)
    b1p = jnp.pad(b1.reshape(1, SIZE_HID), ((0, 0), (0, HID_PAD - SIZE_HID)))
    w2p = jnp.pad(w2, ((0, HID_PAD - SIZE_HID),
                       (0, OUT_PAD - SIZE_OUT))).astype(jnp.bfloat16)
    b2p = jnp.pad(b2.reshape(1, SIZE_OUT), ((0, 0), (0, OUT_PAD - SIZE_OUT)))
    xb = x.astype(jnp.bfloat16)

    # --- batch tiling: TM=256 fills the v6e/v7x MXU once B is large; for small
    # B just round up to a sublane multiple of 8 and run a single grid step. ---
    tm = 256 if B >= 256 else max(8, ((B + 7) // 8) * 8)
    bp = ((B + tm - 1) // tm) * tm
    if bp != B:
        xb = jnp.pad(xb, ((0, bp - B), (0, 0)))
    grid = (bp // tm,)

    out = pl.pallas_call(
        mlp_kernel,
        out_shape=jax.ShapeDtypeStruct((bp, OUT_PAD), jnp.float32),
        grid_spec=pltpu.PrefetchScalarGridSpec(
            num_scalar_prefetch=0,
            grid=grid,
            in_specs=[
                pl.BlockSpec((tm, SIZE_IN), lambda i: (i, 0)),       # x batch tile
                pl.BlockSpec((SIZE_IN, HID_PAD), lambda i: (0, 0)),  # W1 (revisited)
                pl.BlockSpec((1, HID_PAD), lambda i: (0, 0)),        # b1 (revisited)
                pl.BlockSpec((HID_PAD, OUT_PAD), lambda i: (0, 0)),  # W2 (revisited)
                pl.BlockSpec((1, OUT_PAD), lambda i: (0, 0)),        # b2 (revisited)
            ],
            out_specs=pl.BlockSpec((tm, OUT_PAD), lambda i: (i, 0)),
        ),
        compiler_params=pltpu.CompilerParams(
            dimension_semantics=("parallel",)),
    )(xb, w1p, b1p, w2p, b2p)

    return out[:B, :SIZE_OUT]


def init_params(key):
    # Mirror torch.nn.Linear default init: U(-1/sqrt(fan_in), 1/sqrt(fan_in)).
    k1, k2, k3, k4 = jax.random.split(key, 4)
    bound1 = 1.0 / jnp.sqrt(SIZE_IN)
    bound2 = 1.0 / jnp.sqrt(SIZE_HID)
    w1 = jax.random.uniform(k1, (SIZE_IN, SIZE_HID), jnp.float32, -bound1, bound1)
    b1 = jax.random.uniform(k2, (1, SIZE_HID), jnp.float32, -bound1, bound1)
    w2 = jax.random.uniform(k3, (SIZE_HID, SIZE_OUT), jnp.float32, -bound2, bound2)
    b2 = jax.random.uniform(k4, (1, SIZE_OUT), jnp.float32, -bound2, bound2)
    return w1, b1, w2, b2


if __name__ == "__main__":
    key = jax.random.PRNGKey(0)
    kx, kp = jax.random.split(key)

    B = 8  # small batch
    x = jax.random.normal(kx, (B, SIZE_IN), jnp.float32)
    w1, b1, w2, b2 = init_params(kp)

    out = jax.block_until_ready(nn_forward(x, w1, b1, w2, b2))
    assert out.shape == (B, SIZE_OUT)

    # Reference with the same bf16 casts / f32 accumulation as the kernel (tight check).
    xb = x.astype(jnp.bfloat16)
    w1b = w1.astype(jnp.bfloat16)
    w2b = w2.astype(jnp.bfloat16)
    h = jnp.maximum(jnp.dot(xb, w1b, preferred_element_type=jnp.float32) + b1, 0.0)
    ref = jnp.dot(h.astype(jnp.bfloat16), w2b,
                  preferred_element_type=jnp.float32) + b2
    assert jnp.allclose(out, ref, atol=2e-3, rtol=2e-3), \
        float(jnp.max(jnp.abs(out - ref)))

    # Sanity check vs. the pure-f32 forward (loose: weights are bf16-quantized).
    ref32 = jnp.maximum(x @ w1 + b1, 0.0) @ w2 + b2
    assert jnp.allclose(out, ref32, atol=5e-2, rtol=5e-2)

    print("KERNEL_OK")
</pallas_src>

<mosaic_0001>
module attributes {stable_mosaic.version = 11 : i64} {
  func.func @mlp_kernel(%arg0: i32, %arg1: memref<8x784xbf16, #tpu.memory_space<vmem>>, %arg2: memref<784x512xbf16, #tpu.memory_space<vmem>>, %arg3: memref<1x512xf32, #tpu.memory_space<vmem>>, %arg4: memref<512x128xbf16, #tpu.memory_space<vmem>>, %arg5: memref<1x128xf32, #tpu.memory_space<vmem>>, %arg6: memref<8x128xf32, #tpu.memory_space<vmem>>) attributes {dimension_semantics = [#tpu.dimension_semantics<parallel>], iteration_bounds = array<i64: 1>, scalar_prefetch = 0 : i64, scratch_operands = 0 : i64, tpu.core_type = #tpu.core_type<tc>, window_params = [{transform_indices = @transform_0, window_bounds = array<i64: 8, 784>}, {pipeline_mode = #tpu.pipeline_mode<synchronous>, transform_indices = @transform_1, window_bounds = array<i64: 784, 512>}, {pipeline_mode = #tpu.pipeline_mode<synchronous>, transform_indices = @transform_2, window_bounds = array<i64: 1, 512>}, {pipeline_mode = #tpu.pipeline_mode<synchronous>, transform_indices = @transform_3, window_bounds = array<i64: 512, 128>}, {pipeline_mode = #tpu.pipeline_mode<synchronous>, transform_indices = @transform_4, window_bounds = array<i64: 1, 128>}, {transform_indices = @transform_5, window_bounds = array<i64: 8, 128>}]} {
    %c0 = arith.constant 0 : index
    %c0_0 = arith.constant 0 : index
    %0 = vector.load %arg1[%c0, %c0_0] : memref<8x784xbf16, #tpu.memory_space<vmem>>, vector<8x784xbf16>
    %c0_1 = arith.constant 0 : index
    %c0_2 = arith.constant 0 : index
    %1 = vector.load %arg2[%c0_1, %c0_2] : memref<784x512xbf16, #tpu.memory_space<vmem>>, vector<784x512xbf16>
    %cst = arith.constant dense<0.000000e+00> : vector<8x512xf32>
    %2 = tpu.matmul %0, %1, %cst {dimension_numbers = #tpu.dot_dimension_numbers<[1], [0], [0], [1], [0, 0, 1, 1], [], []>} : vector<8x784xbf16>, vector<784x512xbf16>, vector<8x512xf32> -> vector<8x512xf32>
    %c0_3 = arith.constant 0 : index
    %c0_4 = arith.constant 0 : index
    %3 = vector.load %arg3[%c0_3, %c0_4] : memref<1x512xf32, #tpu.memory_space<vmem>>, vector<1x512xf32>
    %4 = vector.broadcast %3 : vector<1x512xf32> to vector<8x512xf32>
    %5 = arith.addf %2, %4 : vector<8x512xf32>
    %cst_5 = arith.constant 0.000000e+00 : f32
    %6 = vector.broadcast %cst_5 : f32 to vector<8x512xf32>
    %7 = arith.maximumf %5, %6 : vector<8x512xf32>
    %8 = arith.truncf %7 : vector<8x512xf32> to vector<8x512xbf16>
    %c0_6 = arith.constant 0 : index
    %c0_7 = arith.constant 0 : index
    %9 = vector.load %arg4[%c0_6, %c0_7] : memref<512x128xbf16, #tpu.memory_space<vmem>>, vector<512x128xbf16>
    %cst_8 = arith.constant dense<0.000000e+00> : vector<8x128xf32>
    %10 = tpu.matmul %8, %9, %cst_8 {dimension_numbers = #tpu.dot_dimension_numbers<[1], [0], [0], [1], [0, 0, 1, 1], [], []>} : vector<8x512xbf16>, vector<512x128xbf16>, vector<8x128xf32> -> vector<8x128xf32>
    %c0_9 = arith.constant 0 : index
    %c0_10 = arith.constant 0 : index
    %11 = vector.load %arg5[%c0_9, %c0_10] : memref<1x128xf32, #tpu.memory_space<vmem>>, vector<1x128xf32>
    %12 = vector.broadcast %11 : vector<1x128xf32> to vector<8x128xf32>
    %13 = arith.addf %10, %12 : vector<8x128xf32>
    %c0_11 = arith.constant 0 : index
    %c0_12 = arith.constant 0 : index
    %14 = vector.load %arg6[%c0_11, %c0_12] : memref<8x128xf32, #tpu.memory_space<vmem>>, vector<8x128xf32>
    tpu.vector_store %arg6[%c0_11, %c0_12], %13 {strides = array<i32>} : memref<8x128xf32, #tpu.memory_space<vmem>>, vector<8x128xf32>,
    return
  }
  func.func @transform_0(%arg0: i32) -> (i32, i32) {
    %c0_i32 = arith.constant 0 : i32
    %c0_i32_0 = arith.constant 0 : i32
    return %arg0, %c0_i32 : i32, i32
  }
  func.func @transform_1(%arg0: i32) -> (i32, i32) {
    %c0_i32 = arith.constant 0 : i32
    %c0_i32_0 = arith.constant 0 : i32
    %c0_i32_1 = arith.constant 0 : i32
    return %c0_i32, %c0_i32_0 : i32, i32
  }
  func.func @transform_2(%arg0: i32) -> (i32, i32) {
    %c0_i32 = arith.constant 0 : i32
    %c0_i32_0 = arith.constant 0 : i32
    %c0_i32_1 = arith.constant 0 : i32
    return %c0_i32, %c0_i32_0 : i32, i32
  }
  func.func @transform_3(%arg0: i32) -> (i32, i32) {
    %c0_i32 = arith.constant 0 : i32
    %c0_i32_0 = arith.constant 0 : i32
    %c0_i32_1 = arith.constant 0 : i32
    return %c0_i32, %c0_i32_0 : i32, i32
  }
  func.func @transform_4(%arg0: i32) -> (i32, i32) {
    %c0_i32 = arith.constant 0 : i32
    %c0_i32_0 = arith.constant 0 : i32
    %c0_i32_1 = arith.constant 0 : i32
    return %c0_i32, %c0_i32_0 : i32, i32
  }
  func.func @transform_5(%arg0: i32) -> (i32, i32) {
    %c0_i32 = arith.constant 0 : i32
    %c0_i32_0 = arith.constant 0 : i32
    return %arg0, %c0_i32 : i32, i32
  }
}

</mosaic_0001>

<bundles_post_ra>
// kernel: nn_forward.1
= control target key start
LH: loop header
LB: loop body
LE: loop exit
PB: predicated region body
PF: predicated region fallthrough
CT: control target
= control target key end

     0   :  { %s3373_s0 = inlined_call_operand.vmem [shape: bf16[8,784], index: 0, kind: input, shape index: {}]   ;;  %s3374_s1 = inlined_call_operand.vmem [shape: bf16[784,512], index: 1, kind: input, shape index: {}]   ;;  %s3375_s2 = inlined_call_operand.vmem [shape: f32[1,512], index: 2, kind: input, shape index: {}]   ;;  %s3376_s3 = inlined_call_operand.vmem [shape: bf16[512,128], index: 3, kind: input, shape index: {}]   ;;  %s3377_s4 = inlined_call_operand.vmem [shape: f32[1,128], index: 4, kind: input, shape index: {}]   ;;  %s3378_s5 = inlined_call_operand.hbm [shape: f32[8,128], index: 5, kind: output, shape index: {}]  }
   0x1   :  { %v2258_v0 = vld [vmem:[%s3374_s1 + $0x4] ss:$16 sps:$4 sm:$0xff]   ;;  %v2260_v1 = vld [vmem:[%s3374_s1 + $0xc] ss:$16 sps:$4 sm:$0xff]   ;;  %v2262_v2 = vld [vmem:[%s3374_s1] ss:$16 sps:$4 sm:$0xff]  }
   0x2   :  { %1252 = vmatprep.subr.bf16.mxu0 %v2258_v0  ;;  %v2263_v3 = vld [vmem:[%s3374_s1 + $0x8] ss:$16 sps:$4 sm:$0xff]   ;;  %1416 = vmatprep.subr.bf16.mxu1 %v2260_v1  ;;  %v2264_v4 = vld [vmem:[%s3374_s1 + $0x24] ss:$16 sps:$4 sm:$0xff]   ;;  %v2266_v5 = vld [vmem:[%s3374_s1 + $0x2c] ss:$16 sps:$4 sm:$0xff]  }
   0x3   :  { %1253 = vmatpush1.bf16.msra.mxu0 %v2262_v2  ;;  %1417 = vmatpush1.bf16.msra.mxu1 %v2263_v3  ;;  %v2268_v6 = vld [vmem:[%s3374_s1 + $0x20] ss:$16 sps:$4 sm:$0xff]   ;;  %v2269_v7 = vld [vmem:[%s3374_s1 + $0x28] ss:$16 sps:$4 sm:$0xff]   ;;  %v2270_v8 = vld [vmem:[%s3374_s1 + $0x44] ss:$16 sps:$4 sm:$0xff]  }
   0x4   :  { %1254 = vmatprep.subr.bf16.mxu0 %v2264_v4  ;;  %1418 = vmatprep.subr.bf16.mxu1 %v2266_v5  ;;  %v2272_v9 = vld [vmem:[%s3374_s1 + $0x4c] ss:$16 sps:$4 sm:$0xff]   ;;  %v2274_v10 = vld [vmem:[%s3374_s1 + $0x40] ss:$16 sps:$4 sm:$0xff]   ;;  %v2275_v11 = vld [vmem:[%s3374_s1 + $0x48] ss:$16 sps:$4 sm:$0xff]  }
   0x5   :  { %v2276_v12 = vld [vmem:[%s3374_s1 + $0x64] ss:$16 sps:$4 sm:$0xff]   ;;  %v2278_v13 = vld [vmem:[%s3374_s1 + $0x6c] ss:$16 sps:$4 sm:$0xff]   ;;  %v2280_v14 = vld [vmem:[%s3374_s1 + $0x60] ss:$16 sps:$4 sm:$0xff]  }
   0x6   :  { %v2281_v15 = vld [vmem:[%s3374_s1 + $0x68] ss:$16 sps:$4 sm:$0xff]   ;;  %v2282_v16 = vld [vmem:[%s3374_s1 + $0x84] ss:$16 sps:$4 sm:$0xff]   ;;  %v2284_v17 = vld [vmem:[%s3374_s1 + $0x8c] ss:$16 sps:$4 sm:$0xff]  }
   0x7   :  { %1255 = vmatpush1.bf16.msra.mxu0 %v2268_v6  ;;  %1419 = vmatpush1.bf16.msra.mxu1 %v2269_v7  ;;  %v2286_v18 = vld [vmem:[%s3374_s1 + $0x80] ss:$16 sps:$4 sm:$0xff]   ;;  %v2287_v19 = vld [vmem:[%s3374_s1 + $0x88] ss:$16 sps:$4 sm:$0xff]   ;;  %v2288_v20 = vld [vmem:[%s3374_s1 + $0xa4] ss:$16 sps:$4 sm:$0xff]  }
   0x8   :  { %1256 = vmatprep.subr.bf16.mxu0 %v2270_v8  ;;  %1420 = vmatprep.subr.bf16.mxu1 %v2272_v9  ;;  %v2290_v21 = vld [vmem:[%s3374_s1 + $0xac] ss:$16 sps:$4 sm:$0xff]   ;;  %v2292_v22 = vld [vmem:[%s3374_s1 + $0xa0] ss:$16 sps:$4 sm:$0xff]   ;;  %v2293_v23 = vld [vmem:[%s3374_s1 + $0xa8] ss:$16 sps:$4 sm:$0xff]  }
   0x9   :  { %v2294_v24 = vld [vmem:[%s3374_s1 + $0xc4] ss:$16 sps:$4 sm:$0xff]   ;;  %v2296_v25 = vld [vmem:[%s3374_s1 + $0xcc] ss:$16 sps:$4 sm:$0xff]   ;;  %v2298_v26 = vld [vmem:[%s3374_s1 + $0xc0] ss:$16 sps:$4 sm:$0xff]  }
   0xa   :  { %v2299_v27 = vld [vmem:[%s3374_s1 + $0xc8] ss:$16 sps:$4 sm:$0xff]   ;;  %v2300_v28 = vld [vmem:[%s3374_s1 + $0xe4] ss:$16 sps:$4 sm:$0xff]   ;;  %v2302_v29 = vld [vmem:[%s3374_s1 + $0xec] ss:$16 sps:$4 sm:$0xff]  }
   0xb   :  { %1257 = vmatpush1.bf16.msra.mxu0 %v2274_v10  ;;  %1421 = vmatpush1.bf16.msra.mxu1 %v2275_v11  ;;  %v2304_v30 = vld [vmem:[%s3374_s1 + $0xe0] ss:$16 sps:$4 sm:$0xff]   ;;  %v2305_v31 = vld [vmem:[%s3374_s1 + $0xe8] ss:$16 sps:$4 sm:$0xff]   ;;  %v2306_v32 = vld [vmem:[%s3374_s1 + $0x104] ss:$16 sps:$4 sm:$0xff]  }
   0xc   :  { %1258 = vmatprep.subr.bf16.mxu0 %v2276_v12  ;;  %1422 = vmatprep.subr.bf16.mxu1 %v2278_v13  ;;  %v2308_v33 = vld [vmem:[%s3374_s1 + $0x10c] ss:$16 sps:$4 sm:$0xff]   ;;  %v2310_v34 = vld [vmem:[%s3374_s1 + $0x100] ss:$16 sps:$4 sm:$0xff]   ;;  %v2311_v35 = vld [vmem:[%s3374_s1 + $0x108] ss:$16 sps:$4 sm:$0xff]  }
   0xd   :  { %v2312_v36 = vld [vmem:[%s3374_s1 + $0x124] ss:$16 sps:$4 sm:$0xff]   ;;  %v2314_v37 = vld [vmem:[%s3374_s1 + $0x12c] ss:$16 sps:$4 sm:$0xff]   ;;  %v2316_v38 = vld [vmem:[%s3374_s1 + $0x120] ss:$16 sps:$4 sm:$0xff]  }
   0xe   :  { %v2317_v39 = vld [vmem:[%s3374_s1 + $0x128] ss:$16 sps:$4 sm:$0xff]   ;;  %v2318_v40 = vld [vmem:[%s3374_s1 + $0x144] ss:$16 sps:$4 sm:$0xff]   ;;  %v2320_v41 = vld [vmem:[%s3374_s1 + $0x14c] ss:$16 sps:$4 sm:$0xff]  }
   0xf   :  { %1259 = vmatpush1.bf16.msra.mxu0 %v2280_v14  ;;  %1423 = vmatpush1.bf16.msra.mxu1 %v2281_v15  ;;  %v2322_v42 = vld [vmem:[%s3374_s1 + $0x140] ss:$16 sps:$4 sm:$0xff]   ;;  %v2323_v43 = vld [vmem:[%s3374_s1 + $0x148] ss:$16 sps:$4 sm:$0xff]   ;;  %v2324_v44 = vld [vmem:[%s3374_s1 + $0x164] ss:$16 sps:$4 sm:$0xff]  }
  0x10   :  { %1260 = vmatprep.subr.bf16.mxu0 %v2282_v16  ;;  %1424 = vmatprep.subr.bf16.mxu1 %v2284_v17  ;;  %v2326_v45 = vld [vmem:[%s3374_s1 + $0x16c] ss:$16 sps:$4 sm:$0xff]   ;;  %v22_v46 = vld [vmem:[%s3373_s0] sm:$0xff]  ;;  %v2329_v49 = vld [vmem:[%s3374_s1 + $0x168] ss:$16 sps:$4 sm:$0xff]  }
  0x11   :  { %v2328_v47 = vld [vmem:[%s3374_s1 + $0x160] ss:$16 sps:$4 sm:$0xff]   ;;  %v1947_v48 = vcombine.high %v22_v46, %v22_v46  ;;  %v2330_v50 = vld [vmem:[%s3374_s1 + $0x184] ss:$16 sps:$4 sm:$0xff]   ;;  %v2332_v51 = vld [vmem:[%s3374_s1 + $0x18c] ss:$16 sps:$4 sm:$0xff]   ;;  %v1946_v4 = vcombine.low %v22_v46, %v22_v46 }
  0x12   :  { %v2334_v52 = vld [vmem:[%s3374_s1 + $0x180] ss:$16 sps:$4 sm:$0xff]   ;;  %v2335_v53 = vld [vmem:[%s3374_s1 + $0x188] ss:$16 sps:$4 sm:$0xff]   ;;  %v2336_v54 = vld [vmem:[%s3374_s1 + $0x1a4] ss:$16 sps:$4 sm:$0xff]  }
  0x13   :  { %1261 = vmatpush1.bf16.msra.mxu0 %v2286_v18  ;;  %1425 = vmatpush1.bf16.msra.mxu1 %v2287_v19  ;;  %v2338_v55 = vld [vmem:[%s3374_s1 + $0x1ac] ss:$16 sps:$4 sm:$0xff]   ;;  %v2340_v56 = vld [vmem:[%s3374_s1 + $0x1a0] ss:$16 sps:$4 sm:$0xff]   ;;  %v2341_v57 = vld [vmem:[%s3374_s1 + $0x1a8] ss:$16 sps:$4 sm:$0xff]  }
  0x14   :  { %1262 = vmatprep.subr.bf16.mxu0 %v2288_v20  ;;  %1426 = vmatprep.subr.bf16.mxu1 %v2290_v21  ;;  %v2342_v58 = vld [vmem:[%s3374_s1 + $0x1c4] ss:$16 sps:$4 sm:$0xff]   ;;  %v2344_v59 = vld [vmem:[%s3374_s1 + $0x1cc] ss:$16 sps:$4 sm:$0xff]   ;;  %v2346_v60 = vld [vmem:[%s3374_s1 + $0x1c0] ss:$16 sps:$4 sm:$0xff]  }
  0x15   :  { %1284 = vmatprep.mubr.bf16.mxu0 %v1947_v48  ;;  %1448 = vmatprep.mubr.bf16.mxu1 %v1947_v48  ;;  %v2347_v61 = vld [vmem:[%s3374_s1 + $0x1c8] ss:$16 sps:$4 sm:$0xff]   ;;  %v2348_v62 = vld [vmem:[%s3374_s1 + $0x1e4] ss:$16 sps:$4 sm:$0xff]   ;;  %v2350_v63 = vld [vmem:[%s3374_s1 + $0x1ec] ss:$16 sps:$4 sm:$0xff]  }
  0x16   :  { %v2352_v0 = vld [vmem:[%s3374_s1 + $0x1e0] ss:$16 sps:$4 sm:$0xff]   ;;  %v2353_v1 = vld [vmem:[%s3374_s1 + $0x1e8] ss:$16 sps:$4 sm:$0xff]   ;;  %v2358_v2 = vld [vmem:[%s3374_s1 + $0x204] ss:$16 sps:$4 sm:$0xff]  }
  0x17   :  { %1263 = vmatpush1.bf16.msra.mxu0 %v2292_v22  ;;  %1427 = vmatpush1.bf16.msra.mxu1 %v2293_v23  ;;  %v2361_v3 = vld [vmem:[%s3374_s1 + $0x20c] ss:$16 sps:$4 sm:$0xff]   ;;  %v2356_v5 = vld [vmem:[%s3374_s1 + $0x200] ss:$16 sps:$4 sm:$0xff]   ;;  %v2359_v6 = vld [vmem:[%s3374_s1 + $0x208] ss:$16 sps:$4 sm:$0xff]  }
  0x18   :  { %1264 = vmatprep.subr.bf16.mxu0 %v2294_v24  ;;  %1428 = vmatprep.subr.bf16.mxu1 %v2296_v25  ;;  %v2364_v7 = vld [vmem:[%s3374_s1 + $0x224] ss:$16 sps:$4 sm:$0xff]   ;;  %v2367_v8 = vld [vmem:[%s3374_s1 + $0x22c] ss:$16 sps:$4 sm:$0xff]   ;;  %v2362_v9 = vld [vmem:[%s3374_s1 + $0x220] ss:$16 sps:$4 sm:$0xff]  }
  0x19   :  { %v2365_v10 = vld [vmem:[%s3374_s1 + $0x228] ss:$16 sps:$4 sm:$0xff]   ;;  %v2370_v11 = vld [vmem:[%s3374_s1 + $0x244] ss:$16 sps:$4 sm:$0xff]   ;;  %v2373_v12 = vld [vmem:[%s3374_s1 + $0x24c] ss:$16 sps:$4 sm:$0xff]  }
  0x1a   :  { %v2368_v13 = vld [vmem:[%s3374_s1 + $0x240] ss:$16 sps:$4 sm:$0xff]   ;;  %v2371_v14 = vld [vmem:[%s3374_s1 + $0x248] ss:$16 sps:$4 sm:$0xff]   ;;  %v2376_v15 = vld [vmem:[%s3374_s1 + $0x264] ss:$16 sps:$4 sm:$0xff]  }
  0x1b   :  { %1265 = vmatpush1.bf16.msra.mxu0 %v2298_v26  ;;  %1429 = vmatpush1.bf16.msra.mxu1 %v2299_v27  ;;  %v2379_v16 = vld [vmem:[%s3374_s1 + $0x26c] ss:$16 sps:$4 sm:$0xff]   ;;  %v2374_v17 = vld [vmem:[%s3374_s1 + $0x260] ss:$16 sps:$4 sm:$0xff]   ;;  %v2377_v18 = vld [vmem:[%s3374_s1 + $0x268] ss:$16 sps:$4 sm:$0xff]  }
  0x1c   :  { %1266 = vmatprep.subr.bf16.mxu0 %v2300_v28  ;;  %1430 = vmatprep.subr.bf16.mxu1 %v2302_v29  ;;  %v2382_v19 = vld [vmem:[%s3374_s1 + $0x284] ss:$16 sps:$4 sm:$0xff]   ;;  %v2385_v20 = vld [vmem:[%s3374_s1 + $0x28c] ss:$16 sps:$4 sm:$0xff]   ;;  %v2380_v21 = vld [vmem:[%s3374_s1 + $0x280] ss:$16 sps:$4 sm:$0xff]  }
  0x1d   :  { %v2383_v22 = vld [vmem:[%s3374_s1 + $0x288] ss:$16 sps:$4 sm:$0xff]   ;;  %v2388_v23 = vld [vmem:[%s3374_s1 + $0x2a4] ss:$16 sps:$4 sm:$0xff]   ;;  %v2391_v24 = vld [vmem:[%s3374_s1 + $0x2ac] ss:$16 sps:$4 sm:$0xff]  }
  0x1e   :  { %v2386_v25 = vld [vmem:[%s3374_s1 + $0x2a0] ss:$16 sps:$4 sm:$0xff]   ;;  %v2389_v26 = vld [vmem:[%s3374_s1 + $0x2a8] ss:$16 sps:$4 sm:$0xff]   ;;  %v2394_v27 = vld [vmem:[%s3374_s1 + $0x2c4] ss:$16 sps:$4 sm:$0xff]  }
  0x1f   :  { %1267 = vmatpush1.bf16.msra.mxu0 %v2304_v30  ;;  %1431 = vmatpush1.bf16.msra.mxu1 %v2305_v31  ;;  %v2397_v28 = vld [vmem:[%s3374_s1 + $0x2cc] ss:$16 sps:$4 sm:$0xff]   ;;  %v2392_v31 = vld [vmem:[%s3374_s1 + $0x2c0] ss:$16 sps:$4 sm:$0xff]   ;;  %v2419_v48 = vld [vmem:[%s3374_s1 + $0x348] ss:$16 sps:$4 sm:$0xff]  }
  0x20   :  { %1268 = vmatprep.subr.bf16.mxu0 %v2306_v32  ;;  %1432 = vmatprep.subr.bf16.mxu1 %v2308_v33  ;;  %v2923_v29 = vld [vmem:[%s3373_s0 + $0x8] sm:$0xff]  ;;  %v2400_v33 = vld [vmem:[%s3374_s1 + $0x2e4] ss:$16 sps:$4 sm:$0xff]  }
  0x21   :  { %v1949_v30 = vcombine.high %v2923_v29, %v2923_v29  ;;  %v2395_v32 = vld [vmem:[%s3374_s1 + $0x2c8] ss:$16 sps:$4 sm:$0xff]   ;;  %v2421_v46 = vld [vmem:[%s3374_s1 + $0x34c] ss:$16 sps:$4 sm:$0xff]  }
  0x23   :  { %1269 = vmatpush1.bf16.msra.mxu0 %v2310_v34  ;;  %1433 = vmatpush1.bf16.msra.mxu1 %v2311_v35  ;;  %v2403_v34 = vld [vmem:[%s3374_s1 + $0x2ec] ss:$16 sps:$4 sm:$0xff]   ;;  %v2398_v35 = vld [vmem:[%s3374_s1 + $0x2e0] ss:$16 sps:$4 sm:$0xff]  }
  0x24   :  { %1270 = vmatprep.subr.bf16.mxu0 %v2312_v36  ;;  %1434 = vmatprep.subr.bf16.mxu1 %v2314_v37  ;;  %v2401_v36 = vld [vmem:[%s3374_s1 + $0x2e8] ss:$16 sps:$4 sm:$0xff]   ;;  %v2406_v37 = vld [vmem:[%s3374_s1 + $0x304] ss:$16 sps:$4 sm:$0xff]  }
  0x27   :  { %1271 = vmatpush1.bf16.msra.mxu0 %v2316_v38  ;;  %1435 = vmatpush1.bf16.msra.mxu1 %v2317_v39  ;;  %v2409_v38 = vld [vmem:[%s3374_s1 + $0x30c] ss:$16 sps:$4 sm:$0xff]   ;;  %v2404_v39 = vld [vmem:[%s3374_s1 + $0x300] ss:$16 sps:$4 sm:$0xff]  }
  0x28   :  { %1272 = vmatprep.subr.bf16.mxu0 %v2318_v40  ;;  %1436 = vmatprep.subr.bf16.mxu1 %v2320_v41  ;;  %v2407_v40 = vld [vmem:[%s3374_s1 + $0x308] ss:$16 sps:$4 sm:$0xff]   ;;  %v2412_v41 = vld [vmem:[%s3374_s1 + $0x324] ss:$16 sps:$4 sm:$0xff]  }
  0x2b   :  { %1273 = vmatpush1.bf16.msra.mxu0 %v2322_v42  ;;  %1437 = vmatpush1.bf16.msra.mxu1 %v2323_v43  ;;  %v2415_v42 = vld [vmem:[%s3374_s1 + $0x32c] ss:$16 sps:$4 sm:$0xff]   ;;  %v2410_v43 = vld [vmem:[%s3374_s1 + $0x320] ss:$16 sps:$4 sm:$0xff]  }
  0x2c   :  { %1274 = vmatprep.subr.bf16.mxu0 %v2324_v44  ;;  %1438 = vmatprep.subr.bf16.mxu1 %v2326_v45  ;;  %v2413_v44 = vld [vmem:[%s3374_s1 + $0x328] ss:$16 sps:$4 sm:$0xff]   ;;  %v2418_v45 = vld [vmem:[%s3374_s1 + $0x344] ss:$16 sps:$4 sm:$0xff]  }
  0x2f   :  { %1275 = vmatpush1.bf16.msra.mxu0 %v2328_v47  ;;  %1439 = vmatpush1.bf16.msra.mxu1 %v2329_v49  ;;  %v2416_v47 = vld [vmem:[%s3374_s1 + $0x340] ss:$16 sps:$4 sm:$0xff]   ;;  %v2424_v49 = vld [vmem:[%s3374_s1 + $0x364] ss:$16 sps:$4 sm:$0xff]  }
  0x30   :  { %1276 = vmatprep.subr.bf16.mxu0 %v2330_v50  ;;  %1440 = vmatprep.subr.bf16.mxu1 %v2332_v51  ;;  %v2427_v50 = vld [vmem:[%s3374_s1 + $0x36c] ss:$16 sps:$4 sm:$0xff]   ;;  %v2422_v51 = vld [vmem:[%s3374_s1 + $0x360] ss:$16 sps:$4 sm:$0xff]  }
  0x33   :  { %1277 = vmatpush1.bf16.msra.mxu0 %v2334_v52  ;;  %1441 = vmatpush1.bf16.msra.mxu1 %v2335_v53  ;;  %v2425_v52 = vld [vmem:[%s3374_s1 + $0x368] ss:$16 sps:$4 sm:$0xff]   ;;  %v2430_v53 = vld [vmem:[%s3374_s1 + $0x384] ss:$16 sps:$4 sm:$0xff]  }
  0x34   :  { %1278 = vmatprep.subr.bf16.mxu0 %v2336_v54  ;;  %1442 = vmatprep.subr.bf16.mxu1 %v2338_v55  ;;  %v2433_v54 = vld [vmem:[%s3374_s1 + $0x38c] ss:$16 sps:$4 sm:$0xff]   ;;  %v2428_v55 = vld [vmem:[%s3374_s1 + $0x380] ss:$16 sps:$4 sm:$0xff]  }
  0x37   :  { %1279 = vmatpush1.bf16.msra.mxu0 %v2340_v56  ;;  %1443 = vmatpush1.bf16.msra.mxu1 %v2341_v57  ;;  %v2431_v56 = vld [vmem:[%s3374_s1 + $0x388] ss:$16 sps:$4 sm:$0xff]   ;;  %v2436_v57 = vld [vmem:[%s3374_s1 + $0x3a4] ss:$16 sps:$4 sm:$0xff]  }
  0x38   :  { %1280 = vmatprep.subr.bf16.mxu0 %v2342_v58  ;;  %1444 = vmatprep.subr.bf16.mxu1 %v2344_v59  ;;  %v2439_v58 = vld [vmem:[%s3374_s1 + $0x3ac] ss:$16 sps:$4 sm:$0xff]   ;;  %v2434_v59 = vld [vmem:[%s3374_s1 + $0x3a0] ss:$16 sps:$4 sm:$0xff]  }
  0x3b   :  { %1281 = vmatpush1.bf16.msra.mxu0 %v2346_v60  ;;  %1445 = vmatpush1.bf16.msra.mxu1 %v2347_v61  ;;  %v2437_v60 = vld [vmem:[%s3374_s1 + $0x3a8] ss:$16 sps:$4 sm:$0xff]   ;;  %v2442_v61 = vld [vmem:[%s3374_s1 + $0x3c4] ss:$16 sps:$4 sm:$0xff]  }
  0x3c   :  { %1282 = vmatprep.subr.bf16.mxu0 %v2348_v62  ;;  %1446 = vmatprep.subr.bf16.mxu1 %v2350_v63  ;;  %v2445_v62 = vld [vmem:[%s3374_s1 + $0x3cc] ss:$16 sps:$4 sm:$0xff]   ;;  %v2440_v63 = vld [vmem:[%s3374_s1 + $0x3c0] ss:$16 sps:$4 sm:$0xff]  }
  0x3f   :  { %1283 = vmatpush1.bf16.msra.mxu0 %v2352_v0  ;;  %1447 = vmatpush1.bf16.msra.mxu1 %v2353_v1  ;;  %v2443_v0 = vld [vmem:[%s3374_s1 + $0x3c8] ss:$16 sps:$4 sm:$0xff]   ;;  %v2448_v1 = vld [vmem:[%s3374_s1 + $0x3e4] ss:$16 sps:$4 sm:$0xff]  }
  0x40   :  { %1293 = vmatprep.subr.bf16.mxu0 %v2358_v2  ;;  %1457 = vmatprep.subr.bf16.mxu1 %v2361_v3  ;;  %v2451_v2 = vld [vmem:[%s3374_s1 + $0x3ec] ss:$16 sps:$4 sm:$0xff]   ;;  %v2446_v3 = vld [vmem:[%s3374_s1 + $0x3e0] ss:$16 sps:$4 sm:$0xff]  }
  0x42   :  { %1285 = vmatmul.mubr.bf16.vlgmr.msra.gmra.mrb[0].mxu0 %v1946_v4  ;;  %1449 = vmatmul.mubr.bf16.vlgmr.msra.gmra.mrb[0].mxu1 %v1946_v4  ;;  %v2449_v4 = vld [vmem:[%s3374_s1 + $0x3e8] ss:$16 sps:$4 sm:$0xff]  }
  0x43   :  { %1294 = vmatpush1.bf16.msra.mxu0 %v2356_v5  ;;  %1458 = vmatpush1.bf16.msra.mxu1 %v2359_v6  ;;  %v2456_v5 = vld [vmem:[%s3374_s1 + $0x404] ss:$16 sps:$4 sm:$0xff]   ;;  %v2459_v6 = vld [vmem:[%s3374_s1 + $0x40c] ss:$16 sps:$4 sm:$0xff]  }
  0x44   :  { %1295 = vmatprep.subr.bf16.mxu0 %v2364_v7  ;;  %1459 = vmatprep.subr.bf16.mxu1 %v2367_v8  ;;  %v1948_v7 = vcombine.low %v2923_v29, %v2923_v29  ;;  %v2454_v8 = vld [vmem:[%s3374_s1 + $0x400] ss:$16 sps:$4 sm:$0xff]   ;;  %v2489_v29 = vld [vmem:[%s3374_s1 + $0x4ac] ss:$16 sps:$4 sm:$0xff]  }
  0x45   :  { %1325 = vmatprep.mubr.bf16.mxu0 %v1949_v30  ;;  %1489 = vmatprep.mubr.bf16.mxu1 %v1949_v30  ;;  %v2484_v30 = vld [vmem:[%s3374_s1 + $0x4a0] ss:$16 sps:$4 sm:$0xff]  }
  0x47   :  { %1296 = vmatpush1.bf16.msra.mxu0 %v2362_v9  ;;  %1460 = vmatpush1.bf16.msra.mxu1 %v2365_v10  ;;  %v2457_v9 = vld [vmem:[%s3374_s1 + $0x408] ss:$16 sps:$4 sm:$0xff]   ;;  %v2462_v10 = vld [vmem:[%s3374_s1 + $0x424] ss:$16 sps:$4 sm:$0xff]  }
  0x48   :  { %1297 = vmatprep.subr.bf16.mxu0 %v2370_v11  ;;  %1461 = vmatprep.subr.bf16.mxu1 %v2373_v12  ;;  %v3061_v11 = vld [vmem:[%s3373_s0 + $0x10] sm:$0xff]  ;;  %v2465_v12 = vld [vmem:[%s3374_s1 + $0x42c] ss:$16 sps:$4 sm:$0xff]  }
  0x4b   :  { %1298 = vmatpush1.bf16.msra.mxu0 %v2368_v13  ;;  %1462 = vmatpush1.bf16.msra.mxu1 %v2371_v14  ;;  %v1951_v13 = vcombine.high %v3061_v11, %v3061_v11  ;;  %v2460_v14 = vld [vmem:[%s3374_s1 + $0x420] ss:$16 sps:$4 sm:$0xff]  }
  0x4c   :  { %1299 = vmatprep.subr.bf16.mxu0 %v2376_v15  ;;  %1463 = vmatprep.subr.bf16.mxu1 %v2379_v16  ;;  %v2463_v15 = vld [vmem:[%s3374_s1 + $0x428] ss:$16 sps:$4 sm:$0xff]   ;;  %v2468_v16 = vld [vmem:[%s3374_s1 + $0x444] ss:$16 sps:$4 sm:$0xff]  }
  0x4f   :  { %1300 = vmatpush1.bf16.msra.mxu0 %v2374_v17  ;;  %1464 = vmatpush1.bf16.msra.mxu1 %v2377_v18  ;;  %v2471_v17 = vld [vmem:[%s3374_s1 + $0x44c] ss:$16 sps:$4 sm:$0xff]   ;;  %v2466_v18 = vld [vmem:[%s3374_s1 + $0x440] ss:$16 sps:$4 sm:$0xff]  }
  0x50   :  { %1301 = vmatprep.subr.bf16.mxu0 %v2382_v19  ;;  %1465 = vmatprep.subr.bf16.mxu1 %v2385_v20  ;;  %v2469_v19 = vld [vmem:[%s3374_s1 + $0x448] ss:$16 sps:$4 sm:$0xff]   ;;  %v2474_v20 = vld [vmem:[%s3374_s1 + $0x464] ss:$16 sps:$4 sm:$0xff]  }
  0x53   :  { %1302 = vmatpush1.bf16.msra.mxu0 %v2380_v21  ;;  %1466 = vmatpush1.bf16.msra.mxu1 %v2383_v22  ;;  %v2477_v21 = vld [vmem:[%s3374_s1 + $0x46c] ss:$16 sps:$4 sm:$0xff]   ;;  %v2472_v22 = vld [vmem:[%s3374_s1 + $0x460] ss:$16 sps:$4 sm:$0xff]  }
  0x54   :  { %1303 = vmatprep.subr.bf16.mxu0 %v2388_v23  ;;  %1467 = vmatprep.subr.bf16.mxu1 %v2391_v24  ;;  %v2475_v23 = vld [vmem:[%s3374_s1 + $0x468] ss:$16 sps:$4 sm:$0xff]   ;;  %v2480_v24 = vld [vmem:[%s3374_s1 + $0x484] ss:$16 sps:$4 sm:$0xff]  }
  0x57   :  { %1304 = vmatpush1.bf16.msra.mxu0 %v2386_v25  ;;  %1468 = vmatpush1.bf16.msra.mxu1 %v2389_v26  ;;  %v2483_v25 = vld [vmem:[%s3374_s1 + $0x48c] ss:$16 sps:$4 sm:$0xff]   ;;  %v2478_v26 = vld [vmem:[%s3374_s1 + $0x480] ss:$16 sps:$4 sm:$0xff]  }
  0x58   :  { %1305 = vmatprep.subr.bf16.mxu0 %v2394_v27  ;;  %1469 = vmatprep.subr.bf16.mxu1 %v2397_v28  ;;  %v2481_v27 = vld [vmem:[%s3374_s1 + $0x488] ss:$16 sps:$4 sm:$0xff]   ;;  %v2486_v28 = vld [vmem:[%s3374_s1 + $0x4a4] ss:$16 sps:$4 sm:$0xff]  }
  0x5b   :  { %1306 = vmatpush1.bf16.msra.mxu0 %v2392_v31  ;;  %1470 = vmatpush1.bf16.msra.mxu1 %v2395_v32  ;;  %v2487_v31 = vld [vmem:[%s3374_s1 + $0x4a8] ss:$16 sps:$4 sm:$0xff]   ;;  %v2492_v32 = vld [vmem:[%s3374_s1 + $0x4c4] ss:$16 sps:$4 sm:$0xff]  }
  0x5c   :  { %1307 = vmatprep.subr.bf16.mxu0 %v2400_v33  ;;  %1471 = vmatprep.subr.bf16.mxu1 %v2403_v34  ;;  %v2495_v33 = vld [vmem:[%s3374_s1 + $0x4cc] ss:$16 sps:$4 sm:$0xff]   ;;  %v2490_v34 = vld [vmem:[%s3374_s1 + $0x4c0] ss:$16 sps:$4 sm:$0xff]  }
  0x5f   :  { %1308 = vmatpush1.bf16.msra.mxu0 %v2398_v35  ;;  %1472 = vmatpush1.bf16.msra.mxu1 %v2401_v36  ;;  %v2493_v35 = vld [vmem:[%s3374_s1 + $0x4c8] ss:$16 sps:$4 sm:$0xff]   ;;  %v2498_v36 = vld [vmem:[%s3374_s1 + $0x4e4] ss:$16 sps:$4 sm:$0xff]  }
  0x60   :  { %1309 = vmatprep.subr.bf16.mxu0 %v2406_v37  ;;  %1473 = vmatprep.subr.bf16.mxu1 %v2409_v38  ;;  %v2501_v37 = vld [vmem:[%s3374_s1 + $0x4ec] ss:$16 sps:$4 sm:$0xff]   ;;  %v2496_v38 = vld [vmem:[%s3374_s1 + $0x4e0] ss:$16 sps:$4 sm:$0xff]  }
  0x63   :  { %1310 = vmatpush1.bf16.msra.mxu0 %v2404_v39  ;;  %1474 = vmatpush1.bf16.msra.mxu1 %v2407_v40  ;;  %v2499_v39 = vld [vmem:[%s3374_s1 + $0x4e8] ss:$16 sps:$4 sm:$0xff]   ;;  %v2504_v40 = vld [vmem:[%s3374_s1 + $0x504] ss:$16 sps:$4 sm:$0xff]  }
  0x64   :  { %1311 = vmatprep.subr.bf16.mxu0 %v2412_v41  ;;  %1475 = vmatprep.subr.bf16.mxu1 %v2415_v42  ;;  %v2507_v41 = vld [vmem:[%s3374_s1 + $0x50c] ss:$16 sps:$4 sm:$0xff]   ;;  %v2502_v42 = vld [vmem:[%s3374_s1 + $0x500] ss:$16 sps:$4 sm:$0xff]  }
  0x67   :  { %1312 = vmatpush1.bf16.msra.mxu0 %v2410_v43  ;;  %1476 = vmatpush1.bf16.msra.mxu1 %v2413_v44  ;;  %v2505_v43 = vld [vmem:[%s3374_s1 + $0x508] ss:$16 sps:$4 sm:$0xff]   ;;  %v2510_v44 = vld [vmem:[%s3374_s1 + $0x524] ss:$16 sps:$4 sm:$0xff]  }
  0x68   :  { %1313 = vmatprep.subr.bf16.mxu0 %v2418_v45  ;;  %1477 = vmatprep.subr.bf16.mxu1 %v2421_v46  ;;  %v2513_v45 = vld [vmem:[%s3374_s1 + $0x52c] ss:$16 sps:$4 sm:$0xff]  }
  0x6b   :  { %1314 = vmatpush1.bf16.msra.mxu0 %v2416_v47  ;;  %1478 = vmatpush1.bf16.msra.mxu1 %v2419_v48 }
  0x6c   :  { %1315 = vmatprep.subr.bf16.mxu0 %v2424_v49  ;;  %1479 = vmatprep.subr.bf16.mxu1 %v2427_v50 }
  0x6f   :  { %1316 = vmatpush1.bf16.msra.mxu0 %v2422_v51  ;;  %1480 = vmatpush1.bf16.msra.mxu1 %v2425_v52 }
  0x70   :  { %1317 = vmatprep.subr.bf16.mxu0 %v2430_v53  ;;  %1481 = vmatprep.subr.bf16.mxu1 %v2433_v54 }
  0x73   :  { %1318 = vmatpush1.bf16.msra.mxu0 %v2428_v55  ;;  %1482 = vmatpush1.bf16.msra.mxu1 %v2431_v56 }
  0x74   :  { %1319 = vmatprep.subr.bf16.mxu0 %v2436_v57  ;;  %1483 = vmatprep.subr.bf16.mxu1 %v2439_v58 }
  0x77   :  { %1320 = vmatpush1.bf16.msra.mxu0 %v2434_v59  ;;  %1484 = vmatpush1.bf16.msra.mxu1 %v2437_v60 }
  0x78   :  { %1321 = vmatprep.subr.bf16.mxu0 %v2442_v61  ;;  %1485 = vmatprep.subr.bf16.mxu1 %v2445_v62 }
  0x7b   :  { %1322 = vmatpush1.bf16.msra.mxu0 %v2440_v63  ;;  %1486 = vmatpush1.bf16.msra.mxu1 %v2443_v0 }
  0x7c   :  { %1323 = vmatprep.subr.bf16.mxu0 %v2448_v1  ;;  %1487 = vmatprep.subr.bf16.mxu1 %v2451_v2 }
  0x7f   :  { %1324 = vmatpush1.bf16.msra.mxu0 %v2446_v3  ;;  %1488 = vmatpush1.bf16.msra.mxu1 %v2449_v4 }
  0x80   :  { %1334 = vmatprep.subr.bf16.mxu0 %v2456_v5  ;;  %1498 = vmatprep.subr.bf16.mxu1 %v2459_v6 }
  0x82   :  { %1326 = vmatmul.mubr.bf16.vlgmr.msra.gmra.mrb[0].mxu0 %v1948_v7  ;;  %1490 = vmatmul.mubr.bf16.vlgmr.msra.gmra.mrb[0].mxu1 %v1948_v7 }
  0x83   :  { %1335 = vmatpush1.bf16.msra.mxu0 %v2454_v8  ;;  %1499 = vmatpush1.bf16.msra.mxu1 %v2457_v9 }
  0x84   :  { %1336 = vmatprep.subr.bf16.mxu0 %v2462_v10  ;;  %1500 = vmatprep.subr.bf16.mxu1 %v2465_v12 }
  0x85   :  { %1366 = vmatprep.mubr.bf16.mxu0 %v1951_v13  ;;  %1530 = vmatprep.mubr.bf16.mxu1 %v1951_v13 }
  0x87   :  { %1337 = vmatpush1.bf16.msra.mxu0 %v2460_v14  ;;  %1501 = vmatpush1.bf16.msra.mxu1 %v2463_v15 }
  0x88   :  { %1338 = vmatprep.subr.bf16.mxu0 %v2468_v16  ;;  %1502 = vmatprep.subr.bf16.mxu1 %v2471_v17 }
  0x8b   :  { %1339 = vmatpush1.bf16.msra.mxu0 %v2466_v18  ;;  %1503 = vmatpush1.bf16.msra.mxu1 %v2469_v19 }
  0x8c   :  { %1340 = vmatprep.subr.bf16.mxu0 %v2474_v20  ;;  %1504 = vmatprep.subr.bf16.mxu1 %v2477_v21 }
  0x8f   :  { %1341 = vmatpush1.bf16.msra.mxu0 %v2472_v22  ;;  %1505 = vmatpush1.bf16.msra.mxu1 %v2475_v23 }
  0x90   :  { %1342 = vmatprep.subr.bf16.mxu0 %v2480_v24  ;;  %1506 = vmatprep.subr.bf16.mxu1 %v2483_v25 }
  0x93   :  { %1343 = vmatpush1.bf16.msra.mxu0 %v2478_v26  ;;  %1507 = vmatpush1.bf16.msra.mxu1 %v2481_v27 }
  0x94   :  { %1344 = vmatprep.subr.bf16.mxu0 %v2486_v28  ;;  %1508 = vmatprep.subr.bf16.mxu1 %v2489_v29 }
  0x97   :  { %1345 = vmatpush1.bf16.msra.mxu0 %v2484_v30  ;;  %1509 = vmatpush1.bf16.msra.mxu1 %v2487_v31 }
  0x98   :  { %1346 = vmatprep.subr.bf16.mxu0 %v2492_v32  ;;  %1510 = vmatprep.subr.bf16.mxu1 %v2495_v33 }
  0x9b   :  { %1347 = vmatpush1.bf16.msra.mxu0 %v2490_v34  ;;  %1511 = vmatpush1.bf16.msra.mxu1 %v2493_v35 }
  0x9c   :  { %1348 = vmatprep.subr.bf16.mxu0 %v2498_v36  ;;  %1512 = vmatprep.subr.bf16.mxu1 %v2501_v37 }
  0x9f   :  { %1349 = vmatpush1.bf16.msra.mxu0 %v2496_v38  ;;  %1513 = vmatpush1.bf16.msra.mxu1 %v2499_v39 }
  0xa0   :  { %1350 = vmatprep.subr.bf16.mxu0 %v2504_v40  ;;  %1514 = vmatprep.subr.bf16.mxu1 %v2507_v41 }
  0xa1   :  { %10 = vsyncpa [#allocation3], 0  ;;  %v2508_v46 = vld [vmem:[%s3374_s1 + $0x520] ss:$16 sps:$4 sm:$0xff]   ;;  %v2511_v47 = vld [vmem:[%s3374_s1 + $0x528] ss:$16 sps:$4 sm:$0xff]   ;;  %v1950_v10 = vcombine.low %v3061_v11, %v3061_v11 }
  0xa2   :  { %v2516_v48 = vld [vmem:[%s3374_s1 + $0x544] ss:$16 sps:$4 sm:$0xff]   ;;  %v2519_v49 = vld [vmem:[%s3374_s1 + $0x54c] ss:$16 sps:$4 sm:$0xff]   ;;  %v2514_v50 = vld [vmem:[%s3374_s1 + $0x540] ss:$16 sps:$4 sm:$0xff]  }
  0xa3   :  { %1351 = vmatpush1.bf16.msra.mxu0 %v2502_v42  ;;  %1515 = vmatpush1.bf16.msra.mxu1 %v2505_v43  ;;  %v2517_v51 = vld [vmem:[%s3374_s1 + $0x548] ss:$16 sps:$4 sm:$0xff]   ;;  %v2522_v52 = vld [vmem:[%s3374_s1 + $0x564] ss:$16 sps:$4 sm:$0xff]   ;;  %v2525_v53 = vld [vmem:[%s3374_s1 + $0x56c] ss:$16 sps:$4 sm:$0xff]  }
  0xa4   :  { %1352 = vmatprep.subr.bf16.mxu0 %v2510_v44  ;;  %1516 = vmatprep.subr.bf16.mxu1 %v2513_v45  ;;  %v2520_v54 = vld [vmem:[%s3374_s1 + $0x560] ss:$16 sps:$4 sm:$0xff]   ;;  %v2523_v55 = vld [vmem:[%s3374_s1 + $0x568] ss:$16 sps:$4 sm:$0xff]   ;;  %v2528_v56 = vld [vmem:[%s3374_s1 + $0x584] ss:$16 sps:$4 sm:$0xff]  }
  0xa5   :  { %v2531_v57 = vld [vmem:[%s3374_s1 + $0x58c] ss:$16 sps:$4 sm:$0xff]   ;;  %v2526_v58 = vld [vmem:[%s3374_s1 + $0x580] ss:$16 sps:$4 sm:$0xff]   ;;  %v2529_v59 = vld [vmem:[%s3374_s1 + $0x588] ss:$16 sps:$4 sm:$0xff]  }
  0xa6   :  { %v2534_v60 = vld [vmem:[%s3374_s1 + $0x5a4] ss:$16 sps:$4 sm:$0xff]   ;;  %v2537_v61 = vld [vmem:[%s3374_s1 + $0x5ac] ss:$16 sps:$4 sm:$0xff]   ;;  %v2532_v62 = vld [vmem:[%s3374_s1 + $0x5a0] ss:$16 sps:$4 sm:$0xff]  }
  0xa7   :  { %1353 = vmatpush1.bf16.msra.mxu0 %v2508_v46  ;;  %1517 = vmatpush1.bf16.msra.mxu1 %v2511_v47  ;;  %v2535_v63 = vld [vmem:[%s3374_s1 + $0x5a8] ss:$16 sps:$4 sm:$0xff]   ;;  %v2540_v0 = vld [vmem:[%s3374_s1 + $0x5c4] ss:$16 sps:$4 sm:$0xff]   ;;  %v2543_v1 = vld [vmem:[%s3374_s1 + $0x5cc] ss:$16 sps:$4 sm:$0xff]   ;;  %v224_v47 = vlaneseq }
  0xa8   :  { %1354 = vmatprep.subr.bf16.mxu0 %v2516_v48  ;;  %1518 = vmatprep.subr.bf16.mxu1 %v2519_v49  ;;  %v2538_v2 = vld [vmem:[%s3374_s1 + $0x5c0] ss:$16 sps:$4 sm:$0xff]   ;;  %v2541_v3 = vld [vmem:[%s3374_s1 + $0x5c8] ss:$16 sps:$4 sm:$0xff]   ;;  %v2546_v4 = vld [vmem:[%s3374_s1 + $0x5e4] ss:$16 sps:$4 sm:$0xff]  }
  0xa9   :  { %v2549_v5 = vld [vmem:[%s3374_s1 + $0x5ec] ss:$16 sps:$4 sm:$0xff]   ;;  %v2544_v6 = vld [vmem:[%s3374_s1 + $0x5e0] ss:$16 sps:$4 sm:$0xff]   ;;  %v2547_v7 = vld [vmem:[%s3374_s1 + $0x5e8] ss:$16 sps:$4 sm:$0xff]  }
  0xaa   :  { %v2554_v8 = vld [vmem:[%s3374_s1 + $0x604] ss:$16 sps:$4 sm:$0xff]   ;;  %v2557_v9 = vld [vmem:[%s3374_s1 + $0x60c] ss:$16 sps:$4 sm:$0xff]   ;;  %v2552_v12 = vld [vmem:[%s3374_s1 + $0x600] ss:$16 sps:$4 sm:$0xff]  }
  0xab   :  { %1355 = vmatpush1.bf16.msra.mxu0 %v2514_v50  ;;  %1519 = vmatpush1.bf16.msra.mxu1 %v2517_v51  ;;  %v2555_v13 = vld [vmem:[%s3374_s1 + $0x608] ss:$16 sps:$4 sm:$0xff]   ;;  %v2559_v14 = vld [vmem:[%s3376_s3 + $0x40] sm:$0xff]   ;;  %v2615_v15 = vmov 0   ;;  %vm1248_vm0 = vcmask 130048   ;;  %v2567_v23 = vld [vmem:[%s3376_s3 + $0x50] sm:$0xff]  }
  0xac   :  { %1356 = vmatprep.subr.bf16.mxu0 %v2522_v52  ;;  %1520 = vmatprep.subr.bf16.mxu1 %v2525_v53  ;;  %v2560_v11 = vld [vmem:[%s3376_s3 + $0xc0] sm:$0xff]   ;;  %v2558_v16 = vld [vmem:[%s3373_s0 + $0x18] ss:$0 sps:$4 sm:$0xff]   ;;  %v2563_v19 = vld [vmem:[%s3376_s3 + $0x48] sm:$0xff]   ;;  %v225_v48 = vshrl.u32 %v224_v47, 7  ;;  %s2616_s0 = smov [#allocation2]  }
  0xad   :  { %v2561_v17 = vld [vmem:[%s3376_s3] sm:$0xff]   ;;  %v2564_v20 = vld [vmem:[%s3376_s3 + $0xc8] sm:$0xff]   ;;  %v2568_v24 = vld [vmem:[%s3376_s3 + $0xd0] sm:$0xff]   ;;  %s1938_s29 = sshll.u32 %s2616_s0, 4  ;;  %s1939_s29 = int_to_ptr.vmem [resolvable:$true] %s1938_s29 }
  0xae   :  { %v2562_v18 = vld [vmem:[%s3376_s3 + $0x80] sm:$0xff]   ;;  %v2565_v21 = vld [vmem:[%s3376_s3 + $0x8] sm:$0xff]   ;;  %v2569_v25 = vld [vmem:[%s3376_s3 + $0x10] sm:$0xff]   ;;  %v226_v49 = vsub.s32 0, %v225_v48  ;;  %v234_v50 = vsub.s32 2, %v225_v48  ;;  %v230_v52 = vsub.s32 1, %v225_v48  ;;  %p2596_p1 = scmp.lt.s32.totalorder %s1939_s29, %s1939_s29 }
  0xaf   :  { %1357 = vmatpush1.bf16.msra.mxu0 %v2520_v54  ;;  %1521 = vmatpush1.bf16.msra.mxu1 %v2523_v55  ;;  %v2566_v22 = vld [vmem:[%s3376_s3 + $0x88] sm:$0xff]   ;;  %v2570_v26 = vld [vmem:[%s3376_s3 + $0x90] sm:$0xff]   ;;  %v2571_v27 = vld [vmem:[%s3376_s3 + $0x58] sm:$0xff]   ;;  %v238_v53 = vsub.s32 3, %v225_v48  ;;  %s2591_s30 = scalar_lea.vmem %s1939_s29, 128 }
  0xb0   :  { %1358 = vmatprep.subr.bf16.mxu0 %v2528_v56  ;;  %1522 = vmatprep.subr.bf16.mxu1 %v2531_v57  ;;  %v2572_v28 = vld [vmem:[%s3376_s3 + $0xd8] sm:$0xff]   ;;  %v2575_v31 = vld [vmem:[%s3376_s3 + $0x60] sm:$0xff]   ;;  %v2579_v35 = vld [vmem:[%s3376_s3 + $0x68] sm:$0xff]   ;;  %p2592_p0 = scmp.ne.s32.totalorder %s1939_s29, %s2591_s30  ;;  %p2597_p2 = scmp.lt.s32.totalorder %s2591_s30, %s2591_s30 }
  0xb1   :  { %v2573_v29 = vld [vmem:[%s3376_s3 + $0x18] sm:$0xff]   ;;  %v2576_v32 = vld [vmem:[%s3376_s3 + $0xe0] sm:$0xff]   ;;  %v2580_v36 = vld [vmem:[%s3376_s3 + $0xe8] sm:$0xff]  }
  0xb2   :  { %v2574_v30 = vld [vmem:[%s3376_s3 + $0x98] sm:$0xff]   ;;  %v2577_v33 = vld [vmem:[%s3376_s3 + $0x20] sm:$0xff]   ;;  %v2581_v37 = vld [vmem:[%s3376_s3 + $0x28] sm:$0xff]   ;;  %p2598_p3 = por %p2597_p2, %p2596_p1 }
  0xb3   :  { %1359 = vmatpush1.bf16.msra.mxu0 %v2526_v58  ;;  %1523 = vmatpush1.bf16.msra.mxu1 %v2529_v59  ;;  %v2578_v34 = vld [vmem:[%s3376_s3 + $0xa0] sm:$0xff]   ;;  %v2582_v38 = vld [vmem:[%s3376_s3 + $0xa8] sm:$0xff]   ;;  %v2583_v39 = vld [vmem:[%s3376_s3 + $0x70] sm:$0xff]  }
  0xb4   :  { %1360 = vmatprep.subr.bf16.mxu0 %v2534_v60  ;;  %1524 = vmatprep.subr.bf16.mxu1 %v2537_v61  ;;  %v2584_v40 = vld [vmem:[%s3376_s3 + $0xf0] sm:$0xff]   ;;  %v2587_v43 = vld [vmem:[%s3376_s3 + $0x78] sm:$0xff]   ;;  %v222_v51 = vld [vmem:[%s3375_s2] sm:$0xf]  ;;  %p2599_p4 = pnand %p2598_p3, %p2592_p0 }
  0xb5   :  { %v2585_v41 = vld [vmem:[%s3376_s3 + $0x30] sm:$0xff]   ;;  %v2588_v44 = vld [vmem:[%s3376_s3 + $0xf8] sm:$0xff]   ;;  %v227_v54 = vrot.slane %v222_v51, %v226_v49  ;;  %v235_v55 = vrot.slane %v222_v51, %v234_v50  ;;  %v231_v56 = vrot.slane %v222_v51, %v230_v52  ;;  %v239_v57 = vrot.slane %v222_v51, %v238_v53 }
  0xb6   :  { %v2586_v42 = vld [vmem:[%s3376_s3 + $0xb0] sm:$0xff]   ;;  %v2589_v45 = vld [vmem:[%s3376_s3 + $0x38] sm:$0xff]  }
  0xb7   :  { %1361 = vmatpush1.bf16.msra.mxu0 %v2532_v62  ;;  %1525 = vmatpush1.bf16.msra.mxu1 %v2535_v63  ;;  %v2590_v46 = vld [vmem:[%s3376_s3 + $0xb8] sm:$0xff]  }
  0xb8   :  { %1362 = vmatprep.subr.bf16.mxu0 %v2540_v0  ;;  %1526 = vmatprep.subr.bf16.mxu1 %v2543_v1 }
  0xbb   :  { %1363 = vmatpush1.bf16.msra.mxu0 %v2538_v2  ;;  %1527 = vmatpush1.bf16.msra.mxu1 %v2541_v3 }
  0xbc   :  { %1364 = vmatprep.subr.bf16.mxu0 %v2546_v4  ;;  %1528 = vmatprep.subr.bf16.mxu1 %v2549_v5 }
  0xbf   :  { %1365 = vmatpush1.bf16.msra.mxu0 %v2544_v6  ;;  %1529 = vmatpush1.bf16.msra.mxu1 %v2547_v7 }
  0xc0   :  { %1375 = vmatprep.subr.bf16.mxu0 %v2554_v8  ;;  %1539 = vmatprep.subr.bf16.mxu1 %v2557_v9 }
  0xc2   :  { %1367 = vmatmul.mubr.bf16.vlgmr.msra.gmra.mrb[0].mxu0 %v1950_v10  ;;  %1531 = vmatmul.mubr.bf16.vlgmr.msra.gmra.mrb[0].mxu1 %v1950_v10 }
  0xc3   :  { %1376 = vmatpush1.bf16.msra.mxu0 %v2552_v12  ;;  %1540 = vmatpush1.bf16.msra.mxu1 %v2555_v13 }
  0xc4   :  { %1407 = vmatprep.mubr.bf16.mxu0 %v2615_v15  ;;  %1571 = vmatprep.mubr.bf16.mxu1 %v2615_v15 }
  0xc5   :  { %2184 = vmatprep.subr.bf16.mxu0 %v2559_v14  ;;  %2206 = vmatprep.subr.bf16.mxu1 %v2560_v11 }
  0xce   :  { %2149 = vmatmul.mubr.msk.bf16.vlgmr.msra.gmra.mrb[0].mxu0 %vm1248_vm0, %v2558_v16  ;;  %2150 = vmatmul.mubr.msk.bf16.vlgmr.msra.gmra.mrb[0].mxu1 %vm1248_vm0, %v2558_v16  ;;  %v2151_v16 = vld [vmem:[%s3377_s4] ss:$0 sm:$0xff] }
  0xcf   :  { %2185 = vmatpush3.bf16.msra.mxu0 %v2561_v17  ;;  %2207 = vmatpush3.bf16.msra.mxu1 %v2562_v18 }
  0xd0   :  { %2186 = vmatprep.subr.bf16.mxu0 %v2563_v19  ;;  %2208 = vmatprep.subr.bf16.mxu1 %v2564_v20 }
  0xd3   :  { %2187 = vmatpush3.bf16.msra.mxu0 %v2565_v21  ;;  %2209 = vmatpush3.bf16.msra.mxu1 %v2566_v22 }
  0xd4   :  { %2188 = vmatprep.subr.bf16.mxu0 %v2567_v23  ;;  %2210 = vmatprep.subr.bf16.mxu1 %v2568_v24 }
  0xd7   :  { %2189 = vmatpush3.bf16.msra.mxu0 %v2569_v25  ;;  %2211 = vmatpush3.bf16.msra.mxu1 %v2570_v26 }
  0xd8   :  { %2190 = vmatprep.subr.bf16.mxu0 %v2571_v27  ;;  %2212 = vmatprep.subr.bf16.mxu1 %v2572_v28 }
  0xdb   :  { %2191 = vmatpush3.bf16.msra.mxu0 %v2573_v29  ;;  %2213 = vmatpush3.bf16.msra.mxu1 %v2574_v30 }
  0xdc   :  { %2192 = vmatprep.subr.bf16.mxu0 %v2575_v31  ;;  %2214 = vmatprep.subr.bf16.mxu1 %v2576_v32 }
  0xdf   :  { %2193 = vmatpush3.bf16.msra.mxu0 %v2577_v33  ;;  %2215 = vmatpush3.bf16.msra.mxu1 %v2578_v34 }
  0xe0   :  { %2194 = vmatprep.subr.bf16.mxu0 %v2579_v35  ;;  %2216 = vmatprep.subr.bf16.mxu1 %v2580_v36 }
  0xe3   :  { %2195 = vmatpush3.bf16.msra.mxu0 %v2581_v37  ;;  %2217 = vmatpush3.bf16.msra.mxu1 %v2582_v38 }
  0xe4   :  { %2196 = vmatprep.subr.bf16.mxu0 %v2583_v39  ;;  %2218 = vmatprep.subr.bf16.mxu1 %v2584_v40 }
  0xe7   :  { %2197 = vmatpush3.bf16.msra.mxu0 %v2585_v41  ;;  %2219 = vmatpush3.bf16.msra.mxu1 %v2586_v42 }
  0xe8   :  { %2198 = vmatprep.subr.bf16.mxu0 %v2587_v43  ;;  %2220 = vmatprep.subr.bf16.mxu1 %v2588_v44 }
  0xeb   :  { %2199 = vmatpush3.bf16.msra.mxu0 %v2589_v45  ;;  %2221 = vmatpush3.bf16.msra.mxu1 %v2590_v46 }
 0x1a1   :  { %v1409_v58 = vpop.f32.mrb[0].mxu0  ;;  %v1573_v59 = vpop.f32.mrb[0].mxu1 }
 0x1a2   :  { %v2228_v60 = vadd.f32 %v1409_v58, %v227_v54  ;;  %v2230_v61 = vadd.f32 %v1573_v59, %v235_v55  ;;  %v1411_v62 = vpop.f32.mrb[1].mxu0  ;;  %v1575_v63 = vpop.f32.mrb[1].mxu1 }
 0x1a3   :  { %v2229_v0 = vadd.f32 %v1411_v62, %v231_v56  ;;  %v2231_v1 = vadd.f32 %v1575_v63, %v239_v57  ;;  %v1413_v2 = vpop.f32.mrb[2].mxu0  ;;  %v1577_v3 = vpop.f32.mrb[2].mxu1 }
 0x1a4   :  { %v1580_v4 = vmax.f32 %v2228_v60, 0.0  ;;  %v1582_v5 = vmax.f32 %v2230_v61, 0.0  ;;  %v1414_v6 = vpop.f32.mrb[3].mxu0  ;;  %v1578_v7 = vpop.f32.mrb[3].mxu1 }
 0x1a5   :  { %v1581_v8 = vmax.f32 %v2229_v0, 0.0  ;;  %v1583_v9 = vmax.f32 %v2231_v1, 0.0 }
 0x1a6   :  { %v1584_v13 = vpack.c.bf16 %v1580_v4, %v1580_v4  ;;  %v1586_v14 = vpack.c.bf16 %v1582_v5, %v1582_v5 }
 0x1a7   :  { %v1585_v10 = vpack.c.bf16 %v1581_v8, %v1581_v8  ;;  %v1587_v12 = vpack.c.bf16 %v1583_v9, %v1583_v9 }
 0x1a9   :  { %1883 = vmatprep.mubr.bf16.mxu0 %v1585_v10  ;;  %1923 = vmatprep.mubr.bf16.mxu1 %v1587_v12 }
 0x1aa   :  { %1884 = vmatmul.mubr.bf16.vlgmr.msra.gmra.mrb[4].mxu0 %v1584_v13  ;;  %1924 = vmatmul.mubr.bf16.vlgmr.msra.gmra.mrb[4].mxu1 %v1586_v14 }
 0x27d   :  { %v2200_v11 = vpop.f32.mrb[4].mxu0  ;;  %v2222_v15 = vpop.f32.mrb[4].mxu1 }
 0x27e   :  { %v2201_v17 = vpop.f32.mrb[5].mxu0  ;;  %v2223_v18 = vpop.f32.mrb[5].mxu1 }
 0x27f   :  { %v2202_v19 = vadd.f32 %v2201_v17, %v2200_v11  ;;  %v2224_v20 = vadd.f32 %v2223_v18, %v2222_v15  ;;  %v2203_v21 = vpop.f32.mrb[6].mxu0  ;;  %v2225_v22 = vpop.f32.mrb[6].mxu1 }
 0x280   :  { %v2204_v23 = vpop.f32.mrb[7].mxu0  ;;  %v2226_v24 = vpop.f32.mrb[7].mxu1 }
 0x281   :  { %v1886_v25 = vadd.f32 %v2202_v19, %v2151_v16 }
 0x283   :  { %v1926_v26 = vadd.f32 %v2224_v20, %v1886_v25 }
 0x285   :  { %1931 = vst [vmem:[#allocation2] sm:$0xff] %v1926_v26 }
 0x286   :  { %2602 = shalt.err (!%p2599_p4)
}
 0x287   :  { %s2603_s7 = scalar_lea.hbm %s3378_s5, 128 }
 0x288   :  { %p2604_p5 = scmp.ne.s32.totalorder %s3378_s5, %s2603_s7  ;;  %p2607_p6 = scmp.lt.u32.totalorder %s2603_s7, %s3378_s5 }
 0x28a   :  { %p2609_p7 = pnand %p2607_p6, %p2604_p5 }
 0x28c   :  { %2612 = shalt.err (!%p2609_p7)
}
 0x28d   :  { %1941 = dma.vmem_to_hbm [thread:$0]  %s1939_s29, 128, %s3378_s5, [#allocation3]  }
 0x28e   :  { %2613 = dma.done.wait [#allocation3], 128  }
 0x28f   :  { %2614 = vsyncadd [#allocation3], 4294967168 }
 0x290   :  { %1945 = vsyncpa [#allocation3], 1 }

</bundles_post_ra>
